<compile_context>
chip_gen: v7x
topology: tpu7x:2x2x1
jax: 0.10.0
libtpu: 0.0.40
codegen_flags: <defaults>
</compile_context>

<pallas_src>
import functools

import jax
import jax.numpy as jnp
from jax import lax
from jax.experimental import pallas as pl
from jax.experimental.pallas import tpu as pltpu


def _round_up(x, m):
    return ((x + m - 1) // m) * m


def _pick_tile(m, candidates=(512, 256, 128, 64, 32, 16, 8)):
    for c in candidates:
        if m % c == 0:
            return c
    return m


# --------------------------------------------------------------------------
# Kernel 1: collapsed feature transform  h = x @ W^T   over (B*N, F_in)
# --------------------------------------------------------------------------
def _feature_kernel(x_ref, w_ref, h_ref):
    # x_ref: (tm, K)   w_ref: (K, F_out)   h_ref: (tm, F_out)
    h_ref[...] = jnp.dot(
        x_ref[...], w_ref[...], preferred_element_type=jnp.float32
    ).astype(h_ref.dtype)


def _feature_transform(x_flat, w_t):
    M, K = x_flat.shape
    _, Nf = w_t.shape
    tm = _pick_tile(M)
    cost = pl.CostEstimate(
        flops=2 * M * K * Nf,
        transcendentals=0,
        bytes_accessed=4 * (M * K + K * Nf + M * Nf),
    )
    return pl.pallas_call(
        _feature_kernel,
        out_shape=jax.ShapeDtypeStruct((M, Nf), jnp.float32),
        grid_spec=pltpu.PrefetchScalarGridSpec(
            num_scalar_prefetch=0,
            grid=(M // tm,),
            in_specs=[
                pl.BlockSpec((tm, K), lambda i: (i, 0)),
                pl.BlockSpec((K, Nf), lambda i: (0, 0)),
            ],
            out_specs=pl.BlockSpec((tm, Nf), lambda i: (i, 0)),
        ),
        compiler_params=pltpu.CompilerParams(
            dimension_semantics=("parallel",)),
        cost_estimate=cost,
    )(x_flat, w_t)


# --------------------------------------------------------------------------
# Kernel 2: per-batch symmetric-normalized aggregation
#   out = d * (adj @ (d * h)) [+ (d*d) * h  for the implicit self loop]
# --------------------------------------------------------------------------
def _agg_kernel(adj_ref, h_ref, o_ref, *, add_loop):
    # adj_ref: (N, N)   h_ref: (N, F_out)   o_ref: (N, F_out)   (batch squeezed)
    adj = adj_ref[...].astype(jnp.float32)
    h = h_ref[...].astype(jnp.float32)

    deg = jnp.sum(adj, axis=-1, keepdims=True)            # (N, 1)
    if add_loop:
        deg = deg + 1.0                                    # self loop, no eye
    deg = jnp.maximum(deg, 1.0)                            # clamp(min=1)
    dis = 1.0 / jnp.sqrt(deg)                              # (N, 1), f32 math

    hs = dis * h                                           # fold col-scaling
    out = dis * jnp.dot(adj, hs, preferred_element_type=jnp.float32)
    if add_loop:
        out = out + (dis * dis) * h                        # diagonal term
    o_ref[...] = out.astype(o_ref.dtype)


def _aggregate(adj, h, add_loop):
    B, N, _ = adj.shape
    F_out = h.shape[-1]
    kernel = functools.partial(_agg_kernel, add_loop=add_loop)
    cost = pl.CostEstimate(
        flops=2 * B * N * N * F_out + 6 * B * N * F_out,
        transcendentals=B * N,
        bytes_accessed=4 * (B * N * N + 2 * B * N * F_out),
    )
    # Raise the scoped VMEM limit only when the double-buffered blocks need it
    # (large-N case, mainly relevant on v6e; tiles stay small here).
    block_bytes = 4 * (N * N + 2 * N * F_out) * 2
    vmem_limit = None
    if block_bytes > 24 * 1024 * 1024:
        vmem_limit = min(block_bytes + (8 << 20), 100 << 20)

    return pl.pallas_call(
        kernel,
        out_shape=jax.ShapeDtypeStruct((B, N, F_out), jnp.float32),
        grid_spec=pltpu.PrefetchScalarGridSpec(
            num_scalar_prefetch=0,
            grid=(B,),
            in_specs=[
                pl.BlockSpec((pl.Squeezed(), N, N), lambda b: (b, 0, 0)),
                pl.BlockSpec((pl.Squeezed(), N, F_out), lambda b: (b, 0, 0)),
            ],
            out_specs=pl.BlockSpec((pl.Squeezed(), N, F_out),
                                   lambda b: (b, 0, 0)),
        ),
        compiler_params=pltpu.CompilerParams(
            dimension_semantics=("parallel",),
            vmem_limit_bytes=vmem_limit),
        cost_estimate=cost,
    )(adj, h)


# --------------------------------------------------------------------------
# Public wrapper
# --------------------------------------------------------------------------
def dense_graph_conv(x, adj, weight, *, add_loop=True):
    """x: (B, N, F_in), adj: (B, N, N), weight: (F_out, F_in) as in nn.Linear."""
    B, N, F_in = x.shape
    F_out = weight.shape[0]

    # Lane-dense feature dims (multiple of 128) and sublane-aligned N.
    N_pad = _round_up(N, 8)
    F_in_pad = _round_up(F_in, 128)
    F_out_pad = _round_up(F_out, 128)

    x_p = jnp.pad(x.astype(jnp.float32),
                  ((0, 0), (0, N_pad - N), (0, F_in_pad - F_in)))
    adj_p = jnp.pad(adj.astype(jnp.float32),
                    ((0, 0), (0, N_pad - N), (0, N_pad - N)))
    w_t = jnp.pad(weight.astype(jnp.float32).T,
                  ((0, F_in_pad - F_in), (0, F_out_pad - F_out)))

    # Stage 1: collapsed feature transform (fills the MXU M dimension).
    h = _feature_transform(x_p.reshape(B * N_pad, F_in_pad), w_t)
    h = h.reshape(B, N_pad, F_out_pad)

    # Stage 2: per-batch normalized aggregation.
    out = _aggregate(adj_p, h, add_loop)
    return out[:, :N, :F_out].astype(x.dtype)


def dense_graph_conv_ref(x, adj, weight, *, add_loop=True):
    """Pure-JAX reference mirroring the PyTorch forward."""
    _, N, _ = x.shape
    if add_loop:
        adj = adj + jnp.eye(N, dtype=adj.dtype)[None]
    out = jnp.einsum("bnf,of->bno", x, weight,
                     precision=jax.lax.Precision.HIGHEST)
    deg_inv_sqrt = jnp.maximum(adj.sum(-1), 1.0) ** -0.5
    adj = deg_inv_sqrt[..., :, None] * adj * deg_inv_sqrt[..., None, :]
    return jnp.matmul(adj, out, precision=jax.lax.Precision.HIGHEST)


if __name__ == "__main__":
    B, N, F_in, F_out = 2, 16, 32, 32

    key = jax.random.PRNGKey(0)
    kx, kadj, kw = jax.random.split(key, 3)

    x = jax.random.normal(kx, (B, N, F_in), dtype=jnp.float32)
    # random nonnegative adjacency (like a sigmoid-score adjacency)
    adj = (jax.random.uniform(kadj, (B, N, N)) > 0.7).astype(jnp.float32)

    # init matching reset_params: U(-stdv, stdv), stdv = 1/sqrt(in_features)
    stdv = 1.0 / (F_in ** 0.5)
    weight = jax.random.uniform(kw, (F_out, F_in), minval=-stdv, maxval=stdv,
                                dtype=jnp.float32)

    out = dense_graph_conv(x, adj, weight)
    out = jax.block_until_ready(out)

    ref = dense_graph_conv_ref(x, adj, weight)
    assert out.shape == (B, N, F_out)
    assert jnp.allclose(out, ref, atol=1e-4, rtol=1e-4), "mismatch vs reference"

    print("KERNEL_OK")
</pallas_src>

<mosaic_0001>
module attributes {stable_mosaic.version = 11 : i64} {
  func.func @_feature_kernel(%arg0: i32, %arg1: memref<32x128xf32, #tpu.memory_space<vmem>>, %arg2: memref<128x128xf32, #tpu.memory_space<vmem>>, %arg3: memref<32x128xf32, #tpu.memory_space<vmem>>) attributes {dimension_semantics = [#tpu.dimension_semantics<parallel>], iteration_bounds = array<i64: 1>, scalar_prefetch = 0 : i64, scratch_operands = 0 : i64, tpu.core_type = #tpu.core_type<tc>, window_params = [{transform_indices = @transform_0, window_bounds = array<i64: 32, 128>}, {pipeline_mode = #tpu.pipeline_mode<synchronous>, transform_indices = @transform_1, window_bounds = array<i64: 128, 128>}, {transform_indices = @transform_2, window_bounds = array<i64: 32, 128>}]} {
    %c0 = arith.constant 0 : index
    %c0_0 = arith.constant 0 : index
    %0 = vector.load %arg1[%c0, %c0_0] : memref<32x128xf32, #tpu.memory_space<vmem>>, vector<32x128xf32>
    %c0_1 = arith.constant 0 : index
    %c0_2 = arith.constant 0 : index
    %1 = vector.load %arg2[%c0_1, %c0_2] : memref<128x128xf32, #tpu.memory_space<vmem>>, vector<128x128xf32>
    %cst = arith.constant dense<0.000000e+00> : vector<32x128xf32>
    %2 = tpu.matmul %0, %1, %cst {dimension_numbers = #tpu.dot_dimension_numbers<[1], [0], [0], [1], [0, 0, 1, 1], [], []>} : vector<32x128xf32>, vector<128x128xf32>, vector<32x128xf32> -> vector<32x128xf32>
    %c0_3 = arith.constant 0 : index
    %c0_4 = arith.constant 0 : index
    %3 = vector.load %arg3[%c0_3, %c0_4] : memref<32x128xf32, #tpu.memory_space<vmem>>, vector<32x128xf32>
    tpu.vector_store %arg3[%c0_3, %c0_4], %2 {strides = array<i32>} : memref<32x128xf32, #tpu.memory_space<vmem>>, vector<32x128xf32>,
    return
  }
  func.func @transform_0(%arg0: i32) -> (i32, i32) {
    %c0_i32 = arith.constant 0 : i32
    %c0_i32_0 = arith.constant 0 : i32
    return %arg0, %c0_i32 : i32, i32
  }
  func.func @transform_1(%arg0: i32) -> (i32, i32) {
    %c0_i32 = arith.constant 0 : i32
    %c0_i32_0 = arith.constant 0 : i32
    %c0_i32_1 = arith.constant 0 : i32
    return %c0_i32, %c0_i32_0 : i32, i32
  }
  func.func @transform_2(%arg0: i32) -> (i32, i32) {
    %c0_i32 = arith.constant 0 : i32
    %c0_i32_0 = arith.constant 0 : i32
    return %arg0, %c0_i32 : i32, i32
  }
}

</mosaic_0001>

<bundles_post_ra>
// kernel: tpu_custom_call.1
= control target key start
LH: loop header
LB: loop body
LE: loop exit
PB: predicated region body
PF: predicated region fallthrough
CT: control target
= control target key end

     0   :  { %7 = vsyncpa [#allocation3], 0  ;;  %s415_s0 = inlined_call_operand.hbm [shape: f32[32,128], index: 0, kind: input, shape index: {}]   ;;  %s416_s1 = inlined_call_operand.hbm [shape: f32[128,128], index: 1, kind: input, shape index: {}]   ;;  %s417_s2 = inlined_call_operand.hbm [shape: f32[32,128], index: 2, kind: output, shape index: {}]  }
   0x1   :  { %8 = vsyncpa [#allocation6], 0 }
   0x2   :  { %9 = vsyncpa [#allocation4], 0  ;;  %s350_s9 = smov [#allocation2]   ;;  %s278_s13 = scalar_lea.hbm %s415_s0, 512 }
   0x3   :  { %s15_s10 = sshll.u32 %s350_s9, 4  ;;  %p279_p0 = scmp.ne.s32.totalorder %s415_s0, %s278_s13  ;;  %s16_s10 = int_to_ptr.vmem [resolvable:$true] %s15_s10 }
   0x4   :  { %p282_p1 = scmp.lt.u32.totalorder %s278_s13, %s415_s0 }
   0x6   :  { %p284_p2 = pnand %p282_p1, %p279_p0 }
   0x8   :  { %287 = shalt.err (!%p284_p2)
}
   0x9   :  { %s288_s18 = scalar_lea.vmem %s16_s10, 512  ;;  %p293_p4 = scmp.lt.s32.totalorder %s16_s10, %s16_s10 }
   0xa   :  { %p289_p3 = scmp.ne.s32.totalorder %s16_s10, %s288_s18  ;;  %p294_p5 = scmp.lt.s32.totalorder %s288_s18, %s288_s18 }
   0xc   :  { %p295_p6 = por %p294_p5, %p293_p4 }
   0xe   :  { %p296_p7 = pnand %p295_p6, %p289_p3 }
  0x10   :  { %299 = shalt.err (!%p296_p7)
}
  0x11   :  { %s351_s19 = smov 128   ;;  %s352_s20 = smov 8  }
  0x12   :  { %21 = dma.hbm_to_vmem [thread:$0]  %s415_s0, 512, %s16_s10, [#allocation3], %s351_s19, %s351_s19, %s352_s20  }
  0x13   :  { %s353_s23 = smov [#allocation5]   ;;  %s300_s27 = scalar_lea.hbm %s416_s1, 2048 }
  0x14   :  { %s27_s24 = sshll.u32 %s353_s23, 4  ;;  %p301_p8 = scmp.ne.s32.totalorder %s416_s1, %s300_s27  ;;  %s28_s24 = int_to_ptr.vmem [resolvable:$true] %s27_s24 }
  0x15   :  { %p304_p9 = scmp.lt.u32.totalorder %s300_s27, %s416_s1 }
  0x17   :  { %p306_p10 = pnand %p304_p9, %p301_p8 }
  0x19   :  { %309 = shalt.err (!%p306_p10)
}
  0x1a   :  { %s310_s4 = scalar_lea.vmem %s28_s24, 2048  ;;  %p315_p12 = scmp.lt.s32.totalorder %s28_s24, %s28_s24 }
  0x1b   :  { %p311_p11 = scmp.ne.s32.totalorder %s28_s24, %s310_s4  ;;  %p316_p13 = scmp.lt.s32.totalorder %s310_s4, %s310_s4 }
  0x1d   :  { %p317_p0 = por %p316_p13, %p315_p12 }
  0x1f   :  { %p318_p1 = pnand %p317_p0, %p311_p11 }
  0x21   :  { %321 = shalt.err (!%p318_p1)
}
  0x22   :  { %33 = dma.hbm_to_vmem [thread:$0]  %s416_s1, 2048, %s28_s24, [#allocation6], %s351_s19, %s351_s19, %s352_s20  }
  0x23   :  { %344 = dma.done.wait [#allocation3], 512  }
  0x24   :  { %345 = vsyncadd [#allocation3], 4294966784 }
  0x25   :  { %346 = dma.done.wait [#allocation6], 2048  }
  0x26   :  { %347 = vsyncadd [#allocation6], 4294965248  ;;  %v44_v0 = vld [vmem:[#allocation5] sm:$0xff]  ;;  %v45_v1 = vld [vmem:[#allocation5 + $0x8] sm:$0xff]  ;;  %s354_s1 = smov [#allocation7]  }
  0x27   :  { %v46_v2 = vld [vmem:[#allocation5 + $0x10] sm:$0xff]  ;;  %v225_v3 = vpack.c.bf16 %v45_v1, %v44_v0  ;;  %v47_v4 = vld [vmem:[#allocation5 + $0x18] sm:$0xff]  ;;  %v48_v6 = vld [vmem:[#allocation5 + $0x20] sm:$0xff]  ;;  %s154_s6 = sshll.u32 %s354_s1, 4  ;;  %s155_s6 = int_to_ptr.vmem [resolvable:$true] %s154_s6 }
  0x28   :  { %v229_v5 = vpack.c.bf16 %v47_v4, %v46_v2  ;;  %v49_v7 = vld [vmem:[#allocation5 + $0x28] sm:$0xff]  ;;  %v40_v9 = vld [vmem:[#allocation2] sm:$0xff]  ;;  %v42_v10 = vld [vmem:[#allocation2 + $0x10] sm:$0xff]  ;;  %s322_s7 = scalar_lea.vmem %s155_s6, 512  ;;  %p327_p3 = scmp.lt.s32.totalorder %s155_s6, %s155_s6 }
  0x29   :  { %226 = vmatprep.subr.bf16.mxu0 %v225_v3  ;;  %257 = vmatprep.subr.bf16.mxu1 %v225_v3  ;;  %v233_v8 = vpack.c.bf16 %v49_v7, %v48_v6  ;;  %v50_v11 = vld [vmem:[#allocation5 + $0x30] sm:$0xff]  ;;  %v51_v12 = vld [vmem:[#allocation5 + $0x38] sm:$0xff]  ;;  %v52_v14 = vld [vmem:[#allocation5 + $0x40] sm:$0xff]  ;;  %p323_p2 = scmp.ne.s32.totalorder %s155_s6, %s322_s7  ;;  %p328_p4 = scmp.lt.s32.totalorder %s322_s7, %s322_s7 }
  0x2a   :  { %228 = vmatpush3.bf16.msra.mxu0 %v225_v3  ;;  %265 = vmatpush3.bf16.msra.mxu1 %v225_v3  ;;  %v237_v13 = vpack.c.bf16 %v51_v12, %v50_v11  ;;  %v53_v15 = vld [vmem:[#allocation5 + $0x48] sm:$0xff]  ;;  %v54_v17 = vld [vmem:[#allocation5 + $0x50] sm:$0xff]  ;;  %v55_v18 = vld [vmem:[#allocation5 + $0x58] sm:$0xff] }
  0x2b   :  { %230 = vmatprep.subr.bf16.mxu0 %v229_v5  ;;  %258 = vmatprep.subr.bf16.mxu1 %v229_v5  ;;  %v241_v16 = vpack.c.bf16 %v53_v15, %v52_v14  ;;  %v245_v19 = vpack.c.bf16 %v55_v18, %v54_v17  ;;  %v56_v20 = vld [vmem:[#allocation5 + $0x60] sm:$0xff]  ;;  %v57_v21 = vld [vmem:[#allocation5 + $0x68] sm:$0xff]  ;;  %v58_v23 = vld [vmem:[#allocation5 + $0x70] sm:$0xff]  ;;  %p329_p5 = por %p328_p4, %p327_p3 }
  0x2c   :  { %219 = vmatprep.mubr.f32.mxu0 %v40_v9  ;;  %222 = vmatprep.mubr.f32.mxu1 %v42_v10  ;;  %v249_v22 = vpack.c.bf16 %v57_v21, %v56_v20  ;;  %v59_v24 = vld [vmem:[#allocation5 + $0x78] sm:$0xff]  ;;  %v41_v26 = vld [vmem:[#allocation2 + $0x8] sm:$0xff] }
  0x2d   :  { %v253_v25 = vpack.c.bf16 %v59_v24, %v58_v23  ;;  %v43_v27 = vld [vmem:[#allocation2 + $0x18] sm:$0xff]  ;;  %p330_p6 = pnand %p329_p5, %p323_p2 }
  0x2e   :  { %232 = vmatpush3.bf16.msra.mxu0 %v229_v5  ;;  %266 = vmatpush3.bf16.msra.mxu1 %v229_v5 }
  0x2f   :  { %234 = vmatprep.subr.bf16.mxu0 %v233_v8  ;;  %259 = vmatprep.subr.bf16.mxu1 %v233_v8 }
  0x32   :  { %236 = vmatpush3.bf16.msra.mxu0 %v233_v8  ;;  %267 = vmatpush3.bf16.msra.mxu1 %v233_v8 }
  0x33   :  { %238 = vmatprep.subr.bf16.mxu0 %v237_v13  ;;  %260 = vmatprep.subr.bf16.mxu1 %v237_v13 }
  0x36   :  { %240 = vmatpush3.bf16.msra.mxu0 %v237_v13  ;;  %268 = vmatpush3.bf16.msra.mxu1 %v237_v13 }
  0x37   :  { %242 = vmatprep.subr.bf16.mxu0 %v241_v16  ;;  %261 = vmatprep.subr.bf16.mxu1 %v241_v16 }
  0x3a   :  { %244 = vmatpush3.bf16.msra.mxu0 %v241_v16  ;;  %269 = vmatpush3.bf16.msra.mxu1 %v241_v16 }
  0x3b   :  { %246 = vmatprep.subr.bf16.mxu0 %v245_v19  ;;  %262 = vmatprep.subr.bf16.mxu1 %v245_v19 }
  0x3e   :  { %248 = vmatpush3.bf16.msra.mxu0 %v245_v19  ;;  %270 = vmatpush3.bf16.msra.mxu1 %v245_v19 }
  0x3f   :  { %250 = vmatprep.subr.bf16.mxu0 %v249_v22  ;;  %263 = vmatprep.subr.bf16.mxu1 %v249_v22 }
  0x42   :  { %252 = vmatpush3.bf16.msra.mxu0 %v249_v22  ;;  %271 = vmatpush3.bf16.msra.mxu1 %v249_v22 }
  0x43   :  { %254 = vmatprep.subr.bf16.mxu0 %v253_v25  ;;  %264 = vmatprep.subr.bf16.mxu1 %v253_v25 }
  0x46   :  { %256 = vmatpush3.bf16.msra.mxu0 %v253_v25  ;;  %272 = vmatpush3.bf16.msra.mxu1 %v253_v25 }
  0x49   :  { %220 = vmatmul.mubr.f32.vlgmr.msra.gmra.mrb[0].mxu0 %v41_v26  ;;  %223 = vmatmul.mubr.f32.vlgmr.msra.gmra.mrb[0].mxu1 %v43_v27 }
 0x11c   :  { %v221_v28 = vpop.f32.mrb[0].mxu0  ;;  %v224_v29 = vpop.f32.mrb[0].mxu1 }
 0x11d   :  { %146 = vst [vmem:[#allocation7 + $0x8] sm:$0xff] %v221_v28  ;;  %148 = vst [vmem:[#allocation7 + $0x18] sm:$0xff] %v224_v29  ;;  %v126_v30 = vpop.f32.mrb[1].mxu0  ;;  %v136_v31 = vpop.f32.mrb[1].mxu1 }
 0x11e   :  { %145 = vst [vmem:[#allocation7] sm:$0xff] %v126_v30  ;;  %147 = vst [vmem:[#allocation7 + $0x10] sm:$0xff] %v136_v31 }
 0x11f   :  { %333 = shalt.err (!%p330_p6)
}
 0x120   :  { %s334_s10 = scalar_lea.hbm %s417_s2, 512 }
 0x121   :  { %p335_p7 = scmp.ne.s32.totalorder %s417_s2, %s334_s10  ;;  %p338_p8 = scmp.lt.u32.totalorder %s334_s10, %s417_s2 }
 0x123   :  { %p340_p9 = pnand %p338_p8, %p335_p7 }
 0x125   :  { %343 = shalt.err (!%p340_p9)
}
 0x126   :  { %160 = dma.vmem_to_hbm [thread:$0]  %s155_s6, 512, %s417_s2, [#allocation4], %s351_s19, %s351_s19, %s352_s20  }
 0x127   :  { %348 = dma.done.wait [#allocation4], 512  }
 0x128   :  { %349 = vsyncadd [#allocation4], 4294966784 }
 0x129   :  { %164 = vsyncpa [#allocation3], 1 }
 0x12a   :  { %165 = vsyncpa [#allocation6], 1 }
 0x12b   :  { %166 = vsyncpa [#allocation4], 1 }

</bundles_post_ra>
